<compile_context>
chip_gen: v6e
topology: v6e:2x2x1
jax: 0.10.0
libtpu: 0.0.40
codegen_flags: <defaults>
</compile_context>

<pallas_src>
import jax
import jax.numpy as jnp
from jax.experimental import pallas as pl
from jax.experimental.pallas import tpu as pltpu


def _identity_kernel(x_ref, o_ref):
    # The entire "forward" of BasicModel: pure pass-through of the tile.
    o_ref[...] = x_ref[...]


_LANES = 1024                      # lane-dense: large multiple of 128
_TARGET_TILE_BYTES = 2 * 1024 * 1024  # ≈2 MiB tile → 4× (in+out double-buffer) = 8 MiB, safe on all gens


def _sublane_rows(dtype) -> int:
    """Native sublane packing tile for the dtype (rows per vreg)."""
    itemsize = jnp.dtype(dtype).itemsize
    return {4: 8, 2: 16, 1: 32}.get(itemsize, 8)


def _round_up(a: int, b: int) -> int:
    return ((a + b - 1) // b) * b


def basic_model_forward(x: jax.Array) -> jax.Array:
    """No-op forward (identity) of BasicModel as a lane-dense Pallas TPU kernel."""
    orig_shape = x.shape
    n = x.size
    if n == 0:
        return x

    dtype = x.dtype
    itemsize = jnp.dtype(dtype).itemsize
    sublane = _sublane_rows(dtype)

    # --- Lane-dense 2D layout: (rows, _LANES), padding the flat tail if needed.
    flat = x.reshape(-1)
    pad_lanes = (-n) % _LANES
    if pad_lanes:
        flat = jnp.pad(flat, (0, pad_lanes))
    rows = flat.size // _LANES

    # --- Row tile: multiple of the dtype's sublane tile, capped at ~2 MiB/block.
    max_rows = max(sublane,
                   (_TARGET_TILE_BYTES // (_LANES * itemsize)) // sublane * sublane)
    tile_r = min(max_rows, _round_up(rows, sublane))

    # Pad rows to a multiple of tile_r (no single-whole-array fallback).
    rows_padded = _round_up(rows, tile_r)
    if rows_padded != rows:
        flat = jnp.pad(flat, (0, (rows_padded - rows) * _LANES))
    x2d = flat.reshape(rows_padded, _LANES)

    grid = (rows_padded // tile_r,)

    out2d = pl.pallas_call(
        _identity_kernel,
        out_shape=jax.ShapeDtypeStruct((rows_padded, _LANES), dtype),
        grid_spec=pl.GridSpec(
            grid=grid,
            in_specs=[pl.BlockSpec((tile_r, _LANES), lambda i: (i, 0))],
            out_specs=pl.BlockSpec((tile_r, _LANES), lambda i: (i, 0)),
        ),
        # Identity: let XLA alias the (padded) input buffer as the output buffer.
        input_output_aliases={0: 0},
        compiler_params=pltpu.CompilerParams(
            dimension_semantics=("parallel",),
        ),
    )(x2d)

    return out2d.reshape(-1)[:n].reshape(orig_shape)


if __name__ == "__main__":
    key = jax.random.PRNGKey(0)
    # Small NCHW input consistent with a generic model interface.
    x = jax.random.normal(key, (2, 4, 16, 16), dtype=jnp.float32)

    y = basic_model_forward(x)
    y = jax.block_until_ready(y)

    # Sanity check: identity semantics (the only well-defined behavior here).
    assert y.shape == x.shape and y.dtype == x.dtype
    assert bool(jnp.all(y == x))

    print("KERNEL_OK")
</pallas_src>

<mosaic_0001>
module attributes {stable_mosaic.version = 11 : i64} {
  func.func @_identity_kernel(%arg0: i32, %arg1: memref<8x1024xf32, #tpu.memory_space<vmem>>, %arg2: memref<8x1024xf32, #tpu.memory_space<vmem>>) attributes {dimension_semantics = [#tpu.dimension_semantics<parallel>], iteration_bounds = array<i64: 1>, scalar_prefetch = 0 : i64, scratch_operands = 0 : i64, tpu.core_type = #tpu.core_type<tc>, window_params = [{transform_indices = @transform_0, window_bounds = array<i64: 8, 1024>}, {transform_indices = @transform_1, window_bounds = array<i64: 8, 1024>}]} {
    %c0 = arith.constant 0 : index
    %c0_0 = arith.constant 0 : index
    %0 = vector.load %arg1[%c0, %c0_0] : memref<8x1024xf32, #tpu.memory_space<vmem>>, vector<8x1024xf32>
    %c0_1 = arith.constant 0 : index
    %c0_2 = arith.constant 0 : index
    %1 = vector.load %arg2[%c0_1, %c0_2] : memref<8x1024xf32, #tpu.memory_space<vmem>>, vector<8x1024xf32>
    tpu.vector_store %arg2[%c0_1, %c0_2], %0 {strides = array<i32>} : memref<8x1024xf32, #tpu.memory_space<vmem>>, vector<8x1024xf32>,
    return
  }
  func.func @transform_0(%arg0: i32) -> (i32, i32) {
    %c0_i32 = arith.constant 0 : i32
    %c0_i32_0 = arith.constant 0 : i32
    return %arg0, %c0_i32 : i32, i32
  }
  func.func @transform_1(%arg0: i32) -> (i32, i32) {
    %c0_i32 = arith.constant 0 : i32
    %c0_i32_0 = arith.constant 0 : i32
    return %arg0, %c0_i32 : i32, i32
  }
}

</mosaic_0001>

<bundles_post_ra>
// kernel: tpu_custom_call.1
= control target key start
LH: loop header
LB: loop body
LE: loop exit
PB: predicated region body
PF: predicated region fallthrough
CT: control target
= control target key end

     0   :  { %6 = vsyncpa [#allocation3], 0  ;;  %s116_s0 = inlined_call_operand.hbm [shape: f32[8,1024], index: 0, kind: input, shape index: {}, may-alias: {0,1}]   ;;  %s117_s1 = inlined_call_operand.hbm [shape: f32[8,1024], index: 1, kind: output, shape index: {}, may-alias: {0,1}]  }
   0x1   :  { %7 = vsyncpa [#allocation4], 0  ;;  %s98_s6 = smov [#allocation2]  }
   0x2   :  { %s14_s7 = sshll.u32 %s98_s6, 4  ;;  %s15_s7 = int_to_ptr.vmem [resolvable:$true] %s14_s7 }
   0x3   :  { %s62_s8 = scalar_lea.vmem %s15_s7, 1024  ;;  %p67_p1 = scmp.lt.s32.totalorder %s15_s7, %s15_s7 }
   0x4   :  { %p63_p0 = scmp.ne.s32.totalorder %s15_s7, %s62_s8  ;;  %p68_p2 = scmp.lt.s32.totalorder %s62_s8, %s62_s8 }
   0x6   :  { %p69_p3 = por %p68_p2, %p67_p1 }
   0x8   :  { %p70_p4 = pnand %p69_p3, %p63_p0 }
   0xa   :  { %73 = shalt.err (!%p70_p4)
}
   0xb   :  { %17 = dma.hbm_to_vmem [thread:$0]  %s116_s0, 1024, %s15_s7, [#allocation3]  }
   0xc   :  { %94 = dma.done.wait [#allocation3], 1024  }
   0xd   :  { %95 = vsyncadd [#allocation3], 4294966272  ;;  %s99_s11 = smov [#allocation5]   ;;  %v21_v0 = vld [vmem:[#allocation2] sm:$0xff]  ;;  %v22_v1 = vld [vmem:[#allocation2 + $0x8] sm:$0xff] }
   0xe   :  { %s43_s12 = sshll.u32 %s99_s11, 4  ;;  %v23_v2 = vld [vmem:[#allocation2 + $0x10] sm:$0xff]  ;;  %29 = vst [vmem:[#allocation5] sm:$0xff] %v21_v0  ;;  %30 = vst [vmem:[#allocation5 + $0x8] sm:$0xff] %v22_v1  ;;  %v24_v3 = vld [vmem:[#allocation2 + $0x18] sm:$0xff]  ;;  %s44_s12 = int_to_ptr.vmem [resolvable:$true] %s43_s12 }
   0xf   :  { %31 = vst [vmem:[#allocation5 + $0x10] sm:$0xff] %v23_v2  ;;  %v25_v4 = vld [vmem:[#allocation2 + $0x20] sm:$0xff]  ;;  %v26_v5 = vld [vmem:[#allocation2 + $0x28] sm:$0xff]  ;;  %32 = vst [vmem:[#allocation5 + $0x18] sm:$0xff] %v24_v3  ;;  %s74_s0 = scalar_lea.vmem %s44_s12, 1024  ;;  %p79_p6 = scmp.lt.s32.totalorder %s44_s12, %s44_s12 }
  0x10   :  { %33 = vst [vmem:[#allocation5 + $0x20] sm:$0xff] %v25_v4  ;;  %34 = vst [vmem:[#allocation5 + $0x28] sm:$0xff] %v26_v5  ;;  %v27_v6 = vld [vmem:[#allocation2 + $0x30] sm:$0xff]  ;;  %v28_v7 = vld [vmem:[#allocation2 + $0x38] sm:$0xff]  ;;  %p75_p5 = scmp.ne.s32.totalorder %s44_s12, %s74_s0  ;;  %p80_p7 = scmp.lt.s32.totalorder %s74_s0, %s74_s0 }
  0x11   :  { %35 = vst [vmem:[#allocation5 + $0x30] sm:$0xff] %v27_v6  ;;  %36 = vst [vmem:[#allocation5 + $0x38] sm:$0xff] %v28_v7 }
  0x12   :  { %p81_p8 = por %p80_p7, %p79_p6 }
  0x14   :  { %p82_p9 = pnand %p81_p8, %p75_p5 }
  0x16   :  { %85 = shalt.err (!%p82_p9)
}
  0x17   :  { %46 = dma.vmem_to_hbm [thread:$0]  %s44_s12, 1024, %s117_s1, [#allocation4]  }
  0x18   :  { %96 = dma.done.wait [#allocation4], 1024  }
  0x19   :  { %97 = vsyncadd [#allocation4], 4294966272 }
  0x1a   :  { %50 = vsyncpa [#allocation3], 1 }
  0x1b   :  { %51 = vsyncpa [#allocation4], 1 }

</bundles_post_ra>
